<compile_context>
chip_gen: v7x
topology: tpu7x:2x2x1
jax: 0.10.0
libtpu: 0.0.40
codegen_flags: <defaults>
</compile_context>

<pallas_src>
import jax
import jax.numpy as jnp
from jax.experimental import pallas as pl
from jax.experimental.pallas import tpu as pltpu


def nn_classifier_kernel(x_ref, kprev_ref, knext_ref, wconv_ref, bconv_ref,
                         wout_ref, bout_ref, o_ref):
    """Single-step kernel over the flattened (M = B*L, E) activation slab.

    x_ref:     (M, E)        f32 embeddings, rows in (batch-major, time-minor) order
    kprev_ref: (M, 1)        f32 mask: 0 at the first row of each sentence, else 1
    knext_ref: (M, 1)        f32 mask: 0 at the last row of each sentence, else 1
    wconv_ref: (NL, 3E, E)   bf16 fused conv weights, [prev | center | next] taps stacked on K
    bconv_ref: (NL, 1, E)    f32 conv biases
    wout_ref:  (E, C)        bf16 output linear weight
    bout_ref:  (1, C)        f32 output linear bias
    o_ref:     (M, C)        f32 logits (channels-last; permuted outside)
    """
    x = x_ref[...]                       # (M, E) f32 residual stream (kept f32 on the VPU)
    M, E = x.shape
    num_layers = wconv_ref.shape[0]

    # Sentence-boundary masks, broadcast once (hoisted out of the layer loop).
    keep_prev = jnp.broadcast_to(kprev_ref[...], (M, E))
    keep_next = jnp.broadcast_to(knext_ref[...], (M, E))

    for l in range(num_layers):
        # Row shifts on the XLU instead of materializing concatenated shift buffers.
        x_prev = pltpu.roll(x, shift=1, axis=0) * keep_prev       # row t holds x[t-1]
        x_next = pltpu.roll(x, shift=M - 1, axis=0) * keep_next   # row t holds x[t+1]
        # Fused 3-tap conv: one (M, 3E) @ (3E, E) MXU matmul, bf16 in / f32 accumulate.
        x_cat = jnp.concatenate([x_prev, x, x_next], axis=-1).astype(jnp.bfloat16)
        y = jnp.dot(x_cat, wconv_ref[l], preferred_element_type=jnp.float32) + bconv_ref[l]
        y = jnp.where(y > 0.0, y, 0.01 * y)                       # LeakyReLU(0.01) in f32
        x = x + y                                                 # residual

    logits = (jnp.dot(x.astype(jnp.bfloat16), wout_ref[...],
                      preferred_element_type=jnp.float32) + bout_ref[...])
    o_ref[...] = logits


def _round_up(x, m):
    return (x + m - 1) // m * m


def nn_classifier_forward(tokens, emb_table, wconv, bconv, wout, bout):
    B, L = tokens.shape
    E = emb_table.shape[1]
    NL, K = wconv.shape[0], wconv.shape[1]
    C = wout.shape[1]
    assert K == 3, "kernel is specialized for kernel_size=3 (padding=1)"

    E_pad = _round_up(E, 128)       # lane-dense channels
    C_pad = _round_up(C, 128)       # lane-dense output
    M = B * L
    M_pad = _round_up(M, 8)         # sublane-aligned row count

    # Embedding gather (plain-JAX glue); flatten batch*length into the MXU M dimension.
    x = emb_table[tokens].astype(jnp.float32).reshape(M, E)
    x = jnp.pad(x, ((0, M_pad - M), (0, E_pad - E)))

    # Sentence-boundary masks (zero the t-1 / t+1 taps at t==0 / t==L-1 and on pad rows).
    rows = jnp.arange(M_pad)
    pos = rows % L
    keep_prev = jnp.where((pos == 0) | (rows >= M), 0.0, 1.0).astype(jnp.float32).reshape(M_pad, 1)
    keep_next = jnp.where((pos == L - 1) | (rows >= M), 0.0, 1.0).astype(jnp.float32).reshape(M_pad, 1)

    # Weights: zero-pad channel dims to 128 lanes (exact), fuse the 3 conv taps into one
    # (3*E_pad, E_pad) matrix per layer, cast matmul operands to bf16 (f32 accumulation in-kernel).
    wconv_p = jnp.pad(wconv, ((0, 0), (0, 0), (0, E_pad - E), (0, E_pad - E)))
    wconv_cat = wconv_p.reshape(NL, K * E_pad, E_pad).astype(jnp.bfloat16)
    bconv_p = jnp.pad(bconv, ((0, 0), (0, E_pad - E))).reshape(NL, 1, E_pad).astype(jnp.float32)
    wout_p = jnp.pad(wout, ((0, E_pad - E), (0, C_pad - C))).astype(jnp.bfloat16)
    bout_p = jnp.pad(bout, ((0, C_pad - C),)).reshape(1, C_pad).astype(jnp.float32)

    flops = 2 * M_pad * (NL * K * E_pad * E_pad + E_pad * C_pad)
    bytes_accessed = (x.size * 4 + keep_prev.size * 4 + keep_next.size * 4
                      + wconv_cat.size * 2 + bconv_p.size * 4
                      + wout_p.size * 2 + bout_p.size * 4
                      + M_pad * C_pad * 4)

    out = pl.pallas_call(
        nn_classifier_kernel,
        out_shape=jax.ShapeDtypeStruct((M_pad, C_pad), jnp.float32),
        grid=(1,),
        in_specs=[
            pl.BlockSpec((M_pad, E_pad), lambda i: (0, 0)),
            pl.BlockSpec((M_pad, 1), lambda i: (0, 0)),
            pl.BlockSpec((M_pad, 1), lambda i: (0, 0)),
            pl.BlockSpec((NL, K * E_pad, E_pad), lambda i: (0, 0, 0)),
            pl.BlockSpec((NL, 1, E_pad), lambda i: (0, 0, 0)),
            pl.BlockSpec((E_pad, C_pad), lambda i: (0, 0)),
            pl.BlockSpec((1, C_pad), lambda i: (0, 0)),
        ],
        out_specs=pl.BlockSpec((M_pad, C_pad), lambda i: (0, 0)),
        compiler_params=pltpu.CompilerParams(
            dimension_semantics=("arbitrary",),
            vmem_limit_bytes=64 * 1024 * 1024,
        ),
        cost_estimate=pl.CostEstimate(
            flops=flops, transcendentals=0, bytes_accessed=bytes_accessed),
    )(x, keep_prev, keep_next, wconv_cat, bconv_p, wout_p, bout_p)

    logits = out[:M, :C].reshape(B, L, C)
    # Match torch: logits.permute(0, 2, 1) -> (B, labels_num, L)
    return jnp.transpose(logits, (0, 2, 1))


def reference_forward(tokens, emb_table, wconv, bconv, wout, bout,
                      matmul_dtype=jnp.float32):
    """Pure-JAX reference mirroring the PyTorch semantics.

    With matmul_dtype=bfloat16 it also mirrors the kernel's bf16-operand / f32-accumulate
    matmuls (residual/bias/activation stay f32), so it matches the kernel tightly.
    """
    x = emb_table[tokens].astype(jnp.float32)      # (B, L, E)
    B, L, E = x.shape
    for l in range(wconv.shape[0]):
        xp = jnp.pad(x, ((0, 0), (1, 1), (0, 0)))
        x_cat = jnp.concatenate([xp[:, 0:L], xp[:, 1:L + 1], xp[:, 2:L + 2]], axis=-1)
        w_cat = wconv[l].reshape(3 * E, E)
        y = jnp.dot(x_cat.astype(matmul_dtype), w_cat.astype(matmul_dtype),
                    preferred_element_type=jnp.float32) + bconv[l]
        y = jnp.where(y > 0, y, 0.01 * y)
        x = x + y
    logits = jnp.dot(x.astype(matmul_dtype), wout.astype(matmul_dtype),
                     preferred_element_type=jnp.float32) + bout
    return jnp.transpose(logits, (0, 2, 1))


if __name__ == "__main__":
    # Small shapes consistent with the module.
    B, L = 2, 8
    tokens_num = 32
    embedding_size = 64          # NnClassifier default
    labels_num = 8
    num_layers, kernel_size = 3, 3   # ConvResNet defaults

    key = jax.random.PRNGKey(0)
    k_tok, k_emb, k_wc, k_bc, k_wo, k_bo = jax.random.split(key, 6)

    tokens = jax.random.randint(k_tok, (B, L), 0, tokens_num, dtype=jnp.int32)

    # Deterministic synthetic parameters (shapes match the torch module).
    emb_table = jax.random.normal(k_emb, (tokens_num, embedding_size), jnp.float32)
    emb_table = emb_table.at[0].set(0.0)  # padding_idx=0

    # Conv weights stored as (num_layers, K, in_E, out_E) == torch (out,in,K) transposed.
    wconv = jax.random.normal(
        k_wc, (num_layers, kernel_size, embedding_size, embedding_size), jnp.float32
    ) * 0.05
    bconv = jax.random.normal(k_bc, (num_layers, embedding_size), jnp.float32) * 0.05
    # Linear stored as (in_E, labels) == torch (out,in) transposed.
    wout = jax.random.normal(k_wo, (embedding_size, labels_num), jnp.float32) * 0.05
    bout = jax.random.normal(k_bo, (labels_num,), jnp.float32) * 0.05

    out = nn_classifier_forward(tokens, emb_table, wconv, bconv, wout, bout)
    out = jax.block_until_ready(out)

    # Tight check against a reference that mirrors the kernel's bf16-operand matmuls.
    ref_bf16 = reference_forward(tokens, emb_table, wconv, bconv, wout, bout,
                                 matmul_dtype=jnp.bfloat16)
    # Full-f32 (torch-equivalent) reference, for an informational deviation bound only.
    ref_f32 = reference_forward(tokens, emb_table, wconv, bconv, wout, bout,
                                matmul_dtype=jnp.float32)

    assert out.shape == (B, labels_num, L), out.shape
    assert jnp.allclose(out, ref_bf16, atol=1e-2, rtol=1e-2), \
        float(jnp.max(jnp.abs(out - ref_bf16)))
    _bf16_vs_f32 = float(jnp.max(jnp.abs(out - ref_f32)))  # bf16-operand rounding, not asserted

    print("KERNEL_OK")
</pallas_src>

<mosaic_0001>
module attributes {stable_mosaic.version = 11 : i64} {
  func.func @nn_classifier_kernel(%arg0: i32, %arg1: memref<16x128xf32, #tpu.memory_space<vmem>>, %arg2: memref<16x1xf32, #tpu.memory_space<vmem>>, %arg3: memref<16x1xf32, #tpu.memory_space<vmem>>, %arg4: memref<3x384x128xbf16, #tpu.memory_space<vmem>>, %arg5: memref<3x1x128xf32, #tpu.memory_space<vmem>>, %arg6: memref<128x128xbf16, #tpu.memory_space<vmem>>, %arg7: memref<1x128xf32, #tpu.memory_space<vmem>>, %arg8: memref<16x128xf32, #tpu.memory_space<vmem>>) attributes {dimension_semantics = [#tpu.dimension_semantics<arbitrary>], iteration_bounds = array<i64: 1>, scalar_prefetch = 0 : i64, scratch_operands = 0 : i64, tpu.core_type = #tpu.core_type<tc>, window_params = [{pipeline_mode = #tpu.pipeline_mode<synchronous>, transform_indices = @transform_0, window_bounds = array<i64: 16, 128>}, {pipeline_mode = #tpu.pipeline_mode<synchronous>, transform_indices = @transform_1, window_bounds = array<i64: 16, 1>}, {pipeline_mode = #tpu.pipeline_mode<synchronous>, transform_indices = @transform_2, window_bounds = array<i64: 16, 1>}, {pipeline_mode = #tpu.pipeline_mode<synchronous>, transform_indices = @transform_3, window_bounds = array<i64: 3, 384, 128>}, {pipeline_mode = #tpu.pipeline_mode<synchronous>, transform_indices = @transform_4, window_bounds = array<i64: 3, 1, 128>}, {pipeline_mode = #tpu.pipeline_mode<synchronous>, transform_indices = @transform_5, window_bounds = array<i64: 128, 128>}, {pipeline_mode = #tpu.pipeline_mode<synchronous>, transform_indices = @transform_6, window_bounds = array<i64: 1, 128>}, {pipeline_mode = #tpu.pipeline_mode<synchronous>, transform_indices = @transform_7, window_bounds = array<i64: 16, 128>}]} {
    %c0 = arith.constant 0 : index
    %c0_0 = arith.constant 0 : index
    %0 = vector.load %arg1[%c0, %c0_0] : memref<16x128xf32, #tpu.memory_space<vmem>>, vector<16x128xf32>
    %c0_1 = arith.constant 0 : index
    %c0_2 = arith.constant 0 : index
    %1 = vector.load %arg2[%c0_1, %c0_2] : memref<16x1xf32, #tpu.memory_space<vmem>>, vector<16x1xf32>
    %2 = vector.shape_cast %1 : vector<16x1xf32> to vector<16x1xf32>
    %3 = vector.broadcast %2 : vector<16x1xf32> to vector<16x128xf32>
    %c0_3 = arith.constant 0 : index
    %c0_4 = arith.constant 0 : index
    %4 = vector.load %arg3[%c0_3, %c0_4] : memref<16x1xf32, #tpu.memory_space<vmem>>, vector<16x1xf32>
    %5 = vector.shape_cast %4 : vector<16x1xf32> to vector<16x1xf32>
    %6 = vector.broadcast %5 : vector<16x1xf32> to vector<16x128xf32>
    %c1_i32 = arith.constant 1 : i32
    %7 = tpu.dynamic_rotate %0 by %c1_i32 dim 0 : vector<16x128xf32>, i32 -> vector<16x128xf32>
    %8 = arith.mulf %7, %3 : vector<16x128xf32>
    %c15_i32 = arith.constant 15 : i32
    %9 = tpu.dynamic_rotate %0 by %c15_i32 dim 0 : vector<16x128xf32>, i32 -> vector<16x128xf32>
    %10 = arith.mulf %9, %6 : vector<16x128xf32>
    %11 = tpu.concatenate %8, %0, %10 in 1 : vector<16x128xf32>, vector<16x128xf32>, vector<16x128xf32> -> vector<16x384xf32>
    %12 = arith.truncf %11 : vector<16x384xf32> to vector<16x384xbf16>
    %c0_5 = arith.constant 0 : index
    %c0_6 = arith.constant 0 : index
    %c0_7 = arith.constant 0 : index
    %13 = vector.load %arg4[%c0_5, %c0_6, %c0_7] : memref<3x384x128xbf16, #tpu.memory_space<vmem>>, vector<1x384x128xbf16>
    %14 = vector.shape_cast %13 : vector<1x384x128xbf16> to vector<384x128xbf16>
    %cst = arith.constant dense<0.000000e+00> : vector<16x128xf32>
    %15 = tpu.matmul %12, %14, %cst {dimension_numbers = #tpu.dot_dimension_numbers<[1], [0], [0], [1], [0, 0, 1, 1], [], []>} : vector<16x384xbf16>, vector<384x128xbf16>, vector<16x128xf32> -> vector<16x128xf32>
    %c0_8 = arith.constant 0 : index
    %c0_9 = arith.constant 0 : index
    %c0_10 = arith.constant 0 : index
    %16 = vector.load %arg5[%c0_8, %c0_9, %c0_10] : memref<3x1x128xf32, #tpu.memory_space<vmem>>, vector<1x1x128xf32>
    %17 = vector.shape_cast %16 : vector<1x1x128xf32> to vector<1x128xf32>
    %18 = vector.broadcast %17 : vector<1x128xf32> to vector<16x128xf32>
    %19 = arith.addf %15, %18 : vector<16x128xf32>
    %cst_11 = arith.constant 0.000000e+00 : f32
    %20 = vector.broadcast %cst_11 : f32 to vector<16x128xf32>
    %21 = arith.cmpf ogt, %19, %20 : vector<16x128xf32>
    %cst_12 = arith.constant 0.00999999977 : f32
    %22 = vector.broadcast %cst_12 : f32 to vector<16x128xf32>
    %23 = arith.mulf %22, %19 : vector<16x128xf32>
    %24 = arith.select %21, %19, %23 : vector<16x128xi1>, vector<16x128xf32>
    %25 = arith.addf %0, %24 : vector<16x128xf32>
    %c1_i32_13 = arith.constant 1 : i32
    %26 = tpu.dynamic_rotate %25 by %c1_i32_13 dim 0 : vector<16x128xf32>, i32 -> vector<16x128xf32>
    %27 = arith.mulf %26, %3 : vector<16x128xf32>
    %c15_i32_14 = arith.constant 15 : i32
    %28 = tpu.dynamic_rotate %25 by %c15_i32_14 dim 0 : vector<16x128xf32>, i32 -> vector<16x128xf32>
    %29 = arith.mulf %28, %6 : vector<16x128xf32>
    %30 = tpu.concatenate %27, %25, %29 in 1 : vector<16x128xf32>, vector<16x128xf32>, vector<16x128xf32> -> vector<16x384xf32>
    %31 = arith.truncf %30 : vector<16x384xf32> to vector<16x384xbf16>
    %c1 = arith.constant 1 : index
    %c0_15 = arith.constant 0 : index
    %c0_16 = arith.constant 0 : index
    %32 = vector.load %arg4[%c1, %c0_15, %c0_16] : memref<3x384x128xbf16, #tpu.memory_space<vmem>>, vector<1x384x128xbf16>
    %33 = vector.shape_cast %32 : vector<1x384x128xbf16> to vector<384x128xbf16>
    %cst_17 = arith.constant dense<0.000000e+00> : vector<16x128xf32>
    %34 = tpu.matmul %31, %33, %cst_17 {dimension_numbers = #tpu.dot_dimension_numbers<[1], [0], [0], [1], [0, 0, 1, 1], [], []>} : vector<16x384xbf16>, vector<384x128xbf16>, vector<16x128xf32> -> vector<16x128xf32>
    %c1_18 = arith.constant 1 : index
    %c0_19 = arith.constant 0 : index
    %c0_20 = arith.constant 0 : index
    %35 = vector.load %arg5[%c1_18, %c0_19, %c0_20] : memref<3x1x128xf32, #tpu.memory_space<vmem>>, vector<1x1x128xf32>
    %36 = vector.shape_cast %35 : vector<1x1x128xf32> to vector<1x128xf32>
    %37 = vector.broadcast %36 : vector<1x128xf32> to vector<16x128xf32>
    %38 = arith.addf %34, %37 : vector<16x128xf32>
    %cst_21 = arith.constant 0.000000e+00 : f32
    %39 = vector.broadcast %cst_21 : f32 to vector<16x128xf32>
    %40 = arith.cmpf ogt, %38, %39 : vector<16x128xf32>
    %cst_22 = arith.constant 0.00999999977 : f32
    %41 = vector.broadcast %cst_22 : f32 to vector<16x128xf32>
    %42 = arith.mulf %41, %38 : vector<16x128xf32>
    %43 = arith.select %40, %38, %42 : vector<16x128xi1>, vector<16x128xf32>
    %44 = arith.addf %25, %43 : vector<16x128xf32>
    %c1_i32_23 = arith.constant 1 : i32
    %45 = tpu.dynamic_rotate %44 by %c1_i32_23 dim 0 : vector<16x128xf32>, i32 -> vector<16x128xf32>
    %46 = arith.mulf %45, %3 : vector<16x128xf32>
    %c15_i32_24 = arith.constant 15 : i32
    %47 = tpu.dynamic_rotate %44 by %c15_i32_24 dim 0 : vector<16x128xf32>, i32 -> vector<16x128xf32>
    %48 = arith.mulf %47, %6 : vector<16x128xf32>
    %49 = tpu.concatenate %46, %44, %48 in 1 : vector<16x128xf32>, vector<16x128xf32>, vector<16x128xf32> -> vector<16x384xf32>
    %50 = arith.truncf %49 : vector<16x384xf32> to vector<16x384xbf16>
    %c2 = arith.constant 2 : index
    %c0_25 = arith.constant 0 : index
    %c0_26 = arith.constant 0 : index
    %51 = vector.load %arg4[%c2, %c0_25, %c0_26] : memref<3x384x128xbf16, #tpu.memory_space<vmem>>, vector<1x384x128xbf16>
    %52 = vector.shape_cast %51 : vector<1x384x128xbf16> to vector<384x128xbf16>
    %cst_27 = arith.constant dense<0.000000e+00> : vector<16x128xf32>
    %53 = tpu.matmul %50, %52, %cst_27 {dimension_numbers = #tpu.dot_dimension_numbers<[1], [0], [0], [1], [0, 0, 1, 1], [], []>} : vector<16x384xbf16>, vector<384x128xbf16>, vector<16x128xf32> -> vector<16x128xf32>
    %c2_28 = arith.constant 2 : index
    %c0_29 = arith.constant 0 : index
    %c0_30 = arith.constant 0 : index
    %54 = vector.load %arg5[%c2_28, %c0_29, %c0_30] : memref<3x1x128xf32, #tpu.memory_space<vmem>>, vector<1x1x128xf32>
    %55 = vector.shape_cast %54 : vector<1x1x128xf32> to vector<1x128xf32>
    %56 = vector.broadcast %55 : vector<1x128xf32> to vector<16x128xf32>
    %57 = arith.addf %53, %56 : vector<16x128xf32>
    %cst_31 = arith.constant 0.000000e+00 : f32
    %58 = vector.broadcast %cst_31 : f32 to vector<16x128xf32>
    %59 = arith.cmpf ogt, %57, %58 : vector<16x128xf32>
    %cst_32 = arith.constant 0.00999999977 : f32
    %60 = vector.broadcast %cst_32 : f32 to vector<16x128xf32>
    %61 = arith.mulf %60, %57 : vector<16x128xf32>
    %62 = arith.select %59, %57, %61 : vector<16x128xi1>, vector<16x128xf32>
    %63 = arith.addf %44, %62 : vector<16x128xf32>
    %64 = arith.truncf %63 : vector<16x128xf32> to vector<16x128xbf16>
    %c0_33 = arith.constant 0 : index
    %c0_34 = arith.constant 0 : index
    %65 = vector.load %arg6[%c0_33, %c0_34] : memref<128x128xbf16, #tpu.memory_space<vmem>>, vector<128x128xbf16>
    %cst_35 = arith.constant dense<0.000000e+00> : vector<16x128xf32>
    %66 = tpu.matmul %64, %65, %cst_35 {dimension_numbers = #tpu.dot_dimension_numbers<[1], [0], [0], [1], [0, 0, 1, 1], [], []>} : vector<16x128xbf16>, vector<128x128xbf16>, vector<16x128xf32> -> vector<16x128xf32>
    %c0_36 = arith.constant 0 : index
    %c0_37 = arith.constant 0 : index
    %67 = vector.load %arg7[%c0_36, %c0_37] : memref<1x128xf32, #tpu.memory_space<vmem>>, vector<1x128xf32>
    %68 = vector.broadcast %67 : vector<1x128xf32> to vector<16x128xf32>
    %69 = arith.addf %66, %68 : vector<16x128xf32>
    %c0_38 = arith.constant 0 : index
    %c0_39 = arith.constant 0 : index
    %70 = vector.load %arg8[%c0_38, %c0_39] : memref<16x128xf32, #tpu.memory_space<vmem>>, vector<16x128xf32>
    tpu.vector_store %arg8[%c0_38, %c0_39], %69 {strides = array<i32>} : memref<16x128xf32, #tpu.memory_space<vmem>>, vector<16x128xf32>,
    return
  }
  func.func @transform_0(%arg0: i32) -> (i32, i32) {
    %c0_i32 = arith.constant 0 : i32
    %c0_i32_0 = arith.constant 0 : i32
    %c0_i32_1 = arith.constant 0 : i32
    return %c0_i32, %c0_i32_0 : i32, i32
  }
  func.func @transform_1(%arg0: i32) -> (i32, i32) {
    %c0_i32 = arith.constant 0 : i32
    %c0_i32_0 = arith.constant 0 : i32
    %c0_i32_1 = arith.constant 0 : i32
    return %c0_i32, %c0_i32_0 : i32, i32
  }
  func.func @transform_2(%arg0: i32) -> (i32, i32) {
    %c0_i32 = arith.constant 0 : i32
    %c0_i32_0 = arith.constant 0 : i32
    %c0_i32_1 = arith.constant 0 : i32
    return %c0_i32, %c0_i32_0 : i32, i32
  }
  func.func @transform_3(%arg0: i32) -> (i32, i32, i32) {
    %c0_i32 = arith.constant 0 : i32
    %c0_i32_0 = arith.constant 0 : i32
    %c0_i32_1 = arith.constant 0 : i32
    %c0_i32_2 = arith.constant 0 : i32
    return %c0_i32, %c0_i32_0, %c0_i32_1 : i32, i32, i32
  }
  func.func @transform_4(%arg0: i32) -> (i32, i32, i32) {
    %c0_i32 = arith.constant 0 : i32
    %c0_i32_0 = arith.constant 0 : i32
    %c0_i32_1 = arith.constant 0 : i32
    %c0_i32_2 = arith.constant 0 : i32
    return %c0_i32, %c0_i32_0, %c0_i32_1 : i32, i32, i32
  }
  func.func @transform_5(%arg0: i32) -> (i32, i32) {
    %c0_i32 = arith.constant 0 : i32
    %c0_i32_0 = arith.constant 0 : i32
    %c0_i32_1 = arith.constant 0 : i32
    return %c0_i32, %c0_i32_0 : i32, i32
  }
  func.func @transform_6(%arg0: i32) -> (i32, i32) {
    %c0_i32 = arith.constant 0 : i32
    %c0_i32_0 = arith.constant 0 : i32
    %c0_i32_1 = arith.constant 0 : i32
    return %c0_i32, %c0_i32_0 : i32, i32
  }
  func.func @transform_7(%arg0: i32) -> (i32, i32) {
    %c0_i32 = arith.constant 0 : i32
    %c0_i32_0 = arith.constant 0 : i32
    %c0_i32_1 = arith.constant 0 : i32
    return %c0_i32, %c0_i32_0 : i32, i32
  }
}

</mosaic_0001>

<bundles_post_ra>
// kernel: tpu_custom_call.1
= control target key start
LH: loop header
LB: loop body
LE: loop exit
PB: predicated region body
PF: predicated region fallthrough
CT: control target
= control target key end

     0   :  { %12 = vsyncpa [#allocation3], 0  ;;  %s2064_s0 = inlined_call_operand.hbm [shape: f32[16,128], index: 0, kind: input, shape index: {}]   ;;  %s2065_s1 = inlined_call_operand.hbm [shape: f32[16,1], index: 1, kind: input, shape index: {}]   ;;  %s2066_s2 = inlined_call_operand.hbm [shape: f32[16,1], index: 2, kind: input, shape index: {}]   ;;  %s2067_s3 = inlined_call_operand.hbm [shape: bf16[3,384,128], index: 3, kind: input, shape index: {}]   ;;  %s2068_s4 = inlined_call_operand.hbm [shape: f32[3,1,128], index: 4, kind: input, shape index: {}]   ;;  %s2069_s5 = inlined_call_operand.hbm [shape: bf16[128,128], index: 5, kind: input, shape index: {}]   ;;  %s2070_s6 = inlined_call_operand.hbm [shape: f32[1,128], index: 6, kind: input, shape index: {}]   ;;  %s2071_s7 = inlined_call_operand.hbm [shape: f32[16,128], index: 7, kind: output, shape index: {}]  }
   0x1   :  { %13 = vsyncpa [#allocation6], 0 }
   0x2   :  { %14 = vsyncpa [#allocation9], 0 }
   0x3   :  { %15 = vsyncpa [#allocation12], 0 }
   0x4   :  { %16 = vsyncpa [#allocation4], 0  ;;  %s1753_s24 = smov [#allocation5]   ;;  %s1754_s26 = smov [#allocation8]  }
   0x5   :  { %s34_s25 = sshll.u32 %s1753_s24, 4  ;;  %s58_s27 = sshll.u32 %s1754_s26, 4  ;;  %s35_s25 = int_to_ptr.vmem [resolvable:$true] %s34_s25  ;;  %s1810_s27 = int_to_ptr.vmem [resolvable:$true] %s58_s27 }
   0x6   :  { %s1567_s30 = scalar_lea.hbm %s2065_s1, 256 }
   0x7   :  { %p1568_p0 = scmp.ne.s32.totalorder %s2065_s1, %s1567_s30  ;;  %p1571_p1 = scmp.lt.u32.totalorder %s1567_s30, %s2065_s1 }
   0x9   :  { %p1573_p2 = pnand %p1571_p1, %p1568_p0 }
   0xb   :  { %1576 = shalt.err (!%p1573_p2)
}
   0xc   :  { %s1577_s12 = scalar_lea.vmem %s35_s25, 256  ;;  %p1582_p4 = scmp.lt.s32.totalorder %s35_s25, %s35_s25 }
   0xd   :  { %p1578_p3 = scmp.ne.s32.totalorder %s35_s25, %s1577_s12  ;;  %p1583_p5 = scmp.lt.s32.totalorder %s1577_s12, %s1577_s12 }
   0xf   :  { %p1584_p6 = por %p1583_p5, %p1582_p4 }
  0x11   :  { %p1585_p7 = pnand %p1584_p6, %p1578_p3 }
  0x13   :  { %1588 = shalt.err (!%p1585_p7)
}
  0x14   :  { %s1755_s13 = smov 128   ;;  %s1756_s14 = smov 8  }
  0x15   :  { %40 = dma.hbm_to_vmem [thread:$0]  %s2065_s1, 256, %s35_s25, [#allocation6], %s1755_s13, %s1755_s13, %s1756_s14  }
  0x16   :  { %s1589_s19 = scalar_lea.hbm %s2067_s3, 9216 }
  0x17   :  { %p1590_p8 = scmp.ne.s32.totalorder %s2067_s3, %s1589_s19  ;;  %p1593_p9 = scmp.lt.u32.totalorder %s1589_s19, %s2067_s3 }
  0x19   :  { %p1595_p10 = pnand %p1593_p9, %p1590_p8 }
  0x1b   :  { %1598 = shalt.err (!%p1595_p10)
}
  0x1c   :  { %s1599_s24 = scalar_lea.vmem %s1810_s27, 9216  ;;  %p1604_p12 = scmp.lt.s32.totalorder %s1810_s27, %s1810_s27 }
  0x1d   :  { %p1600_p11 = scmp.ne.s32.totalorder %s1810_s27, %s1599_s24  ;;  %p1605_p13 = scmp.lt.s32.totalorder %s1599_s24, %s1599_s24 }
  0x1f   :  { %p1606_p0 = por %p1605_p13, %p1604_p12 }
  0x21   :  { %p1607_p1 = pnand %p1606_p0, %p1600_p11 }
  0x23   :  { %1610 = shalt.err (!%p1607_p1)
}
  0x24   :  { %s1757_s1 = smov 64   ;;  %s1758_s25 = smov 4  }
  0x25   :  { %64 = dma.hbm_to_vmem [thread:$0]  %s2067_s3, 9216, %s1810_s27, [#allocation9], %s1757_s1, %s1757_s1, %s1758_s25  }
  0x26   :  { %s1759_s29 = smov [#allocation11]   ;;  %s1760_s8 = smov [#allocation2]  }
  0x27   :  { %s82_s30 = sshll.u32 %s1759_s29, 4  ;;  %s22_s9 = sshll.u32 %s1760_s8, 4  ;;  %s83_s30 = int_to_ptr.vmem [resolvable:$true] %s82_s30  ;;  %s1844_s9 = int_to_ptr.vmem [resolvable:$true] %s22_s9 }
  0x28   :  { %s1611_s12 = scalar_lea.hbm %s2069_s5, 1024 }
  0x29   :  { %p1612_p2 = scmp.ne.s32.totalorder %s2069_s5, %s1611_s12  ;;  %p1615_p3 = scmp.lt.u32.totalorder %s1611_s12, %s2069_s5 }
  0x2b   :  { %p1617_p4 = pnand %p1615_p3, %p1612_p2 }
  0x2d   :  { %1620 = shalt.err (!%p1617_p4)
}
  0x2e   :  { %s1621_s3 = scalar_lea.vmem %s83_s30, 1024  ;;  %p1626_p6 = scmp.lt.s32.totalorder %s83_s30, %s83_s30 }
  0x2f   :  { %p1622_p5 = scmp.ne.s32.totalorder %s83_s30, %s1621_s3  ;;  %p1627_p7 = scmp.lt.s32.totalorder %s1621_s3, %s1621_s3 }
  0x31   :  { %p1628_p8 = por %p1627_p7, %p1626_p6 }
  0x33   :  { %p1629_p9 = pnand %p1628_p8, %p1622_p5 }
  0x35   :  { %1632 = shalt.err (!%p1629_p9)
}
  0x36   :  { %88 = dma.hbm_to_vmem [thread:$0]  %s2069_s5, 1024, %s83_s30, [#allocation12], %s1757_s1, %s1757_s1, %s1758_s25  }
  0x37   :  { %s1633_s22 = scalar_lea.hbm %s2064_s0, 256 }
  0x38   :  { %p1634_p10 = scmp.ne.s32.totalorder %s2064_s0, %s1633_s22  ;;  %p1637_p11 = scmp.lt.u32.totalorder %s1633_s22, %s2064_s0 }
  0x3a   :  { %p1639_p12 = pnand %p1637_p11, %p1634_p10 }
  0x3c   :  { %1642 = shalt.err (!%p1639_p12)
}
  0x3d   :  { %s1643_s29 = scalar_lea.vmem %s1844_s9, 256  ;;  %p1648_p0 = scmp.lt.s32.totalorder %s1844_s9, %s1844_s9 }
  0x3e   :  { %p1644_p13 = scmp.ne.s32.totalorder %s1844_s9, %s1643_s29  ;;  %p1649_p1 = scmp.lt.s32.totalorder %s1643_s29, %s1643_s29 }
  0x40   :  { %p1650_p2 = por %p1649_p1, %p1648_p0 }
  0x42   :  { %p1651_p3 = pnand %p1650_p2, %p1644_p13 }
  0x44   :  { %1654 = shalt.err (!%p1651_p3)
}
  0x45   :  { %28 = dma.hbm_to_vmem [thread:$0]  %s2064_s0, 256, %s1844_s9, [#allocation3], %s1755_s13, %s1755_s13, %s1756_s14  }
  0x46   :  { %s1761_s25 = smov [#allocation7]   ;;  %s1762_s8 = smov [#allocation10]  }
  0x47   :  { %s46_s30 = sshll.u32 %s1761_s25, 4  ;;  %s70_s10 = sshll.u32 %s1762_s8, 4  ;;  %s47_s30 = int_to_ptr.vmem [resolvable:$true] %s46_s30  ;;  %s1878_s10 = int_to_ptr.vmem [resolvable:$true] %s70_s10 }
  0x48   :  { %s1655_s15 = scalar_lea.hbm %s2066_s2, 256 }
  0x49   :  { %p1656_p4 = scmp.ne.s32.totalorder %s2066_s2, %s1655_s15  ;;  %p1659_p5 = scmp.lt.u32.totalorder %s1655_s15, %s2066_s2 }
  0x4b   :  { %p1661_p6 = pnand %p1659_p5, %p1656_p4 }
  0x4d   :  { %1664 = shalt.err (!%p1661_p6)
}
  0x4e   :  { %s1665_s0 = scalar_lea.vmem %s47_s30, 256  ;;  %p1670_p8 = scmp.lt.s32.totalorder %s47_s30, %s47_s30 }
  0x4f   :  { %p1666_p7 = scmp.ne.s32.totalorder %s47_s30, %s1665_s0  ;;  %p1671_p9 = scmp.lt.s32.totalorder %s1665_s0, %s1665_s0 }
  0x51   :  { %p1672_p10 = por %p1671_p9, %p1670_p8 }
  0x53   :  { %p1673_p11 = pnand %p1672_p10, %p1666_p7 }
  0x55   :  { %1676 = shalt.err (!%p1673_p11)
}
  0x56   :  { %52 = dma.hbm_to_vmem [thread:$0]  %s2066_s2, 256, %s47_s30, [#allocation6], %s1755_s13, %s1755_s13, %s1756_s14  }
  0x57   :  { %s1677_s21 = scalar_lea.hbm %s2068_s4, 48 }
  0x58   :  { %p1678_p12 = scmp.ne.s32.totalorder %s2068_s4, %s1677_s21  ;;  %p1681_p13 = scmp.lt.u32.totalorder %s1677_s21, %s2068_s4 }
  0x5a   :  { %p1683_p0 = pnand %p1681_p13, %p1678_p12 }
  0x5c   :  { %1686 = shalt.err (!%p1683_p0)
}
  0x5d   :  { %s1687_s28 = scalar_lea.vmem %s1878_s10, 48  ;;  %s1691_s2 = scalar_lea.vmem %s1878_s10, 64 }
  0x5e   :  { %p1688_p1 = scmp.ne.s32.totalorder %s1878_s10, %s1687_s28  ;;  %p1692_p2 = scmp.lt.s32.totalorder %s1878_s10, %s1878_s10 }
  0x5f   :  { %p1693_p3 = scmp.lt.s32.totalorder %s1691_s2, %s1687_s28 }
  0x61   :  { %p1694_p4 = por %p1693_p3, %p1692_p2 }
  0x63   :  { %p1695_p5 = pnand %p1694_p4, %p1688_p1 }
  0x65   :  { %1698 = shalt.err (!%p1695_p5)
}
  0x66   :  { %s1763_s29 = smov 16   ;;  %s1764_s5 = smov 1  }
  0x67   :  { %76 = dma.hbm_to_vmem [thread:$0]  %s2068_s4, 48, %s1878_s10, [#allocation9], %s1763_s29, %s1763_s29, %s1764_s5  }
  0x68   :  { %s1765_s30 = smov [#allocation13]   ;;  %s1699_s15 = scalar_lea.hbm %s2070_s6, 16 }
  0x69   :  { %s95_s8 = sshll.u32 %s1765_s30, 4  ;;  %p1700_p6 = scmp.ne.s32.totalorder %s2070_s6, %s1699_s15  ;;  %s96_s8 = int_to_ptr.vmem [resolvable:$true] %s95_s8 }
  0x6a   :  { %p1703_p7 = scmp.lt.u32.totalorder %s1699_s15, %s2070_s6 }
  0x6c   :  { %p1705_p8 = pnand %p1703_p7, %p1700_p6 }
  0x6e   :  { %1708 = shalt.err (!%p1705_p8)
}
  0x6f   :  { %s1709_s0 = scalar_lea.vmem %s96_s8, 16  ;;  %s1713_s4 = scalar_lea.vmem %s96_s8, 32 }
  0x70   :  { %p1710_p9 = scmp.ne.s32.totalorder %s96_s8, %s1709_s0  ;;  %p1714_p10 = scmp.lt.s32.totalorder %s96_s8, %s96_s8 }
  0x71   :  { %p1715_p11 = scmp.lt.s32.totalorder %s1713_s4, %s1709_s0 }
  0x73   :  { %p1716_p12 = por %p1715_p11, %p1714_p10 }
  0x75   :  { %p1717_p13 = pnand %p1716_p12, %p1710_p9 }
  0x77   :  { %1720 = shalt.err (!%p1717_p13)
}
  0x78   :  { %98 = dma.hbm_to_vmem [thread:$0]  %s2070_s6, 16, %s96_s8, [#allocation12]  }
  0x79   :  { %1743 = dma.done.wait [#allocation3], 256  }
  0x7a   :  { %1744 = vsyncadd [#allocation3], 4294967040 }
  0x7b   :  { %1745 = dma.done.wait [#allocation6], 512  }
  0x7c   :  { %1746 = vsyncadd [#allocation6], 4294966784 }
  0x7d   :  { %1747 = dma.done.wait [#allocation9], 9264  }
  0x7e   :  { %1748 = vsyncadd [#allocation9], 4294958032 }
  0x7f   :  { %1749 = dma.done.wait [#allocation12], 1040  }
  0x80   :  { %1750 = vsyncadd [#allocation12], 4294966256  ;;  %v1766_v0 = vmov 0   ;;  %v1767_v1 = vmov 0.0   ;;  %v135_v2 = vld [vmem:[#allocation7] sm:$0xff]  ;;  %v123_v3 = vld [vmem:[#allocation5] sm:$0xff]  ;;  %v149_v34 = vlaneseq }
  0x81   :  { %1486 = vset.pattern.permute.xlu1 %v1766_v0  ;;  %1485 = vset.pattern.permute.xlu0 %v1766_v0  ;;  %v136_v4 = vld [vmem:[#allocation7 + $0x8] sm:$0xff]  ;;  %v124_v5 = vld [vmem:[#allocation5 + $0x8] sm:$0xff]  ;;  %v1487_v6 = vld [vmem:[#allocation8 + $0x40] sm:$0xff]   ;;  %vm1768_vm0 = vmmov 0   ;;  %s1769_s6 = smov [#allocation14]  }
  0x82   :  { %1388 = vmatprep.subr.bf16.mxu1 %v1767_v1  ;;  %139 = vperm.xlu1 %1486, %v135_v2   ;;  %v1488_v7 = vld [vmem:[#allocation8] sm:$0xff]   ;;  %v1490_v9 = vld [vmem:[#allocation8 + $0x48] sm:$0xff]   ;;  %v1493_v12 = vld [vmem:[#allocation8 + $0x50] sm:$0xff]   ;;  %v1942_v35 = vshrl.u32 %v149_v34, 7  ;;  %s1187_s27 = sshll.u32 %s1769_s6, 4  ;;  %s1188_s27 = int_to_ptr.vmem [resolvable:$true] %s1187_s27 }
  0x83   :  { %127 = vperm.xlu0 %1485, %v123_v3   ;;  %1286 = vmatprep.subr.bf16.mxu0 %v1487_v6  ;;  %v1489_v8 = vld [vmem:[#allocation8 + $0x80] sm:$0xff]   ;;  %v1491_v10 = vld [vmem:[#allocation8 + $0x8] sm:$0xff]   ;;  %v1494_v13 = vld [vmem:[#allocation8 + $0x10] sm:$0xff]   ;;  %s1721_s19 = scalar_lea.vmem %s1188_s27, 256  ;;  %p1726_p1 = scmp.lt.s32.totalorder %s1188_s27, %s1188_s27 }
  0x84   :  { %1287 = vmatpush3.bf16.msra.mxu0 %v1488_v7  ;;  %1389 = vmatpush3.bf16.msra.mxu1 %v1489_v8  ;;  %v1492_v11 = vld [vmem:[#allocation8 + $0x88] sm:$0xff]   ;;  %v1495_v14 = vld [vmem:[#allocation8 + $0x90] sm:$0xff]   ;;  %v1496_v15 = vld [vmem:[#allocation8 + $0x58] sm:$0xff]   ;;  %vm158_vm1 = vcmp.lt.s32.totalorder %v1942_v35, 7  ;;  %vm151_vm2 = vcmp.lt.s32.totalorder %v1942_v35, 1  ;;  %p1722_p0 = scmp.ne.s32.totalorder %s1188_s27, %s1721_s19  ;;  %p1727_p2 = scmp.lt.s32.totalorder %s1721_s19, %s1721_s19 }
  0x85   :  { %1288 = vmatprep.subr.bf16.mxu0 %v1490_v9  ;;  %1390 = vmatprep.subr.bf16.mxu1 %v1767_v1  ;;  %v1497_v16 = vld [vmem:[#allocation8 + $0x18] sm:$0xff]   ;;  %v1499_v18 = vld [vmem:[#allocation8 + $0x60] sm:$0xff]   ;;  %v1502_v21 = vld [vmem:[#allocation8 + $0x68] sm:$0xff]  }
  0x86   :  { %144 = vperm.xlu1 %1486, %v136_v4   ;;  %1404 = vmatprep.mubr.msk.bf16.mxu1 %vm1768_vm0, %v1767_v1  ;;  %v1498_v17 = vld [vmem:[#allocation8 + $0x98] sm:$0xff]   ;;  %v1500_v19 = vld [vmem:[#allocation8 + $0x20] sm:$0xff]   ;;  %v1932_v22 = vld [vmem:[#allocation2] sm:$0xff]  ;;  %p1728_p3 = por %p1727_p2, %p1726_p1 }
  0x87   :  { %132 = vperm.xlu0 %1485, %v124_v5   ;;  %v1501_v20 = vld [vmem:[#allocation8 + $0xa0] sm:$0xff]   ;;  %v1934_v23 = vld [vmem:[#allocation2 + $0x8] sm:$0xff]  ;;  %v1503_v24 = vld [vmem:[#allocation8 + $0x28] sm:$0xff]   ;;  %v156_v36 = vrot.slane %v1932_v22, 1  ;;  %v147_v38 = vrot.slane %v1932_v22, 7 }
  0x88   :  { %1289 = vmatpush3.bf16.msra.mxu0 %v1491_v10  ;;  %1391 = vmatpush3.bf16.msra.mxu1 %v1492_v11  ;;  %v164_v25 = vpack.c.bf16 %v1934_v23, %v1932_v22  ;;  %v1504_v26 = vld [vmem:[#allocation8 + $0xa8] sm:$0xff]   ;;  %v1505_v27 = vld [vmem:[#allocation8 + $0x70] sm:$0xff]   ;;  %v1508_v30 = vld [vmem:[#allocation8 + $0x78] sm:$0xff]   ;;  %v157_v37 = vrot.slane %v1934_v23, 1  ;;  %v148_v39 = vrot.slane %v1934_v23, 7  ;;  %p1729_p4 = pnand %p1728_p3, %p1722_p0 }
  0x89   :  { %1290 = vmatprep.subr.bf16.mxu0 %v1493_v12  ;;  %1392 = vmatprep.subr.bf16.mxu1 %v1767_v1  ;;  %v1506_v28 = vld [vmem:[#allocation8 + $0x30] sm:$0xff]   ;;  %v1509_v31 = vld [vmem:[#allocation8 + $0x38] sm:$0xff]   ;;  %v1511_v33 = vld [vmem:[#allocation8 + $0x100] sm:$0xff]  }
  0x8a   :  { %397 = vmatprep.mubr.bf16.mxu0 %v164_v25  ;;  %v1507_v29 = vld [vmem:[#allocation8 + $0xb0] sm:$0xff]   ;;  %v1510_v32 = vld [vmem:[#allocation8 + $0xb8] sm:$0xff]   ;;  %v159_v41 = vsel %vm158_vm1, %v156_v36, %v157_v37  ;;  %v153_v43 = vsel %vm151_vm2, %v148_v39, %v147_v38  ;;  %v160_v44 = vsel %vm158_vm1, %v157_v37, %v156_v36  ;;  %v152_v45 = vsel %vm151_vm2, %v147_v38, %v148_v39  ;;  %v1512_v52 = vld [vmem:[#allocation8 + $0xc0] sm:$0xff]  }
  0x8b   :  { %v1513_v53 = vld [vmem:[#allocation8 + $0x140] sm:$0xff]   ;;  %v1514_v56 = vld [vmem:[#allocation8 + $0x108] sm:$0xff]   ;;  %v1517_v59 = vld [vmem:[#allocation8 + $0x110] sm:$0xff]  }
  0x8c   :  { %1291 = vmatpush3.bf16.msra.mxu0 %v1494_v13  ;;  %1393 = vmatpush3.bf16.msra.mxu1 %v1495_v14  ;;  %v1515_v57 = vld [vmem:[#allocation8 + $0xc8] sm:$0xff]   ;;  %v1518_v60 = vld [vmem:[#allocation8 + $0xd0] sm:$0xff]   ;;  %v1520_v62 = vld [vmem:[#allocation8 + $0x118] sm:$0xff]  }
  0x8d   :  { %1292 = vmatprep.subr.bf16.mxu0 %v1496_v15  ;;  %1394 = vmatprep.subr.bf16.mxu1 %v1767_v1  ;;  %v1516_v58 = vld [vmem:[#allocation8 + $0x148] sm:$0xff]   ;;  %v1519_v61 = vld [vmem:[#allocation8 + $0x150] sm:$0xff]   ;;  %v1521_v63 = vld [vmem:[#allocation8 + $0xd8] sm:$0xff]  }
  0x8e   :  { %v1522_v0 = vld [vmem:[#allocation8 + $0x158] sm:$0xff]   ;;  %v1523_v2 = vld [vmem:[#allocation8 + $0x120] sm:$0xff]   ;;  %v1526_v5 = vld [vmem:[#allocation8 + $0x128] sm:$0xff]  }
  0x8f   :  { %v1524_v3 = vld [vmem:[#allocation8 + $0xe0] sm:$0xff]   ;;  %v1527_v6 = vld [vmem:[#allocation8 + $0xe8] sm:$0xff]   ;;  %v1529_v8 = vld [vmem:[#allocation8 + $0x130] sm:$0xff]  }
  0x90   :  { %1293 = vmatpush3.bf16.msra.mxu0 %v1497_v16  ;;  %1395 = vmatpush3.bf16.msra.mxu1 %v1498_v17  ;;  %v1525_v4 = vld [vmem:[#allocation8 + $0x160] sm:$0xff]   ;;  %v1528_v7 = vld [vmem:[#allocation8 + $0x168] sm:$0xff]   ;;  %v1530_v9 = vld [vmem:[#allocation8 + $0xf0] sm:$0xff]  }
  0x91   :  { %1294 = vmatprep.subr.bf16.mxu0 %v1499_v18  ;;  %1396 = vmatprep.subr.bf16.mxu1 %v1767_v1  ;;  %v1531_v10 = vld [vmem:[#allocation8 + $0x170] sm:$0xff]   ;;  %v1532_v11 = vld [vmem:[#allocation8 + $0x138] sm:$0xff]   ;;  %v1535_v14 = vld [vmem:[#allocation8 + $0x1c0] sm:$0xff]  }
  0x92   :  { %v1533_v12 = vld [vmem:[#allocation8 + $0xf8] sm:$0xff]   ;;  %v1202_v17 = vld [vmem:[#allocation10] ss:$0 sm:$0xff] }
  0x93   :  { %v1534_v13 = vld [vmem:[#allocation8 + $0x178] sm:$0xff]  }
  0x94   :  { %1295 = vmatpush3.bf16.msra.mxu0 %v1500_v19  ;;  %1397 = vmatpush3.bf16.msra.mxu1 %v1501_v20  ;;  %v1561_v35 = vld [vmem:[#allocation11 + $0x10] sm:$0xff]  }
  0x95   :  { %1296 = vmatprep.subr.bf16.mxu0 %v1502_v21  ;;  %1398 = vmatprep.subr.bf16.mxu1 %v1767_v1 }
  0x98   :  { %1297 = vmatpush3.bf16.msra.mxu0 %v1503_v24  ;;  %1399 = vmatpush3.bf16.msra.mxu1 %v1504_v26 }
  0x99   :  { %1298 = vmatprep.subr.bf16.mxu0 %v1505_v27  ;;  %1400 = vmatprep.subr.bf16.mxu1 %v1767_v1 }
  0x9c   :  { %1299 = vmatpush3.bf16.msra.mxu0 %v1506_v28  ;;  %1401 = vmatpush3.bf16.msra.mxu1 %v1507_v29 }
  0x9d   :  { %1300 = vmatprep.subr.bf16.mxu0 %v1508_v30  ;;  %1402 = vmatprep.subr.bf16.mxu1 %v1767_v1 }
  0xa0   :  { %1301 = vmatpush3.bf16.msra.mxu0 %v1509_v31  ;;  %1403 = vmatpush3.bf16.msra.mxu1 %v1510_v32 }
  0xa1   :  { %1317 = vmatprep.subr.bf16.mxu0 %v1511_v33  ;;  %1408 = vmatprep.subr.bf16.mxu1 %v1767_v1 }
 0x101   :  { %v1950_v40 = vpop.permute.xlu1 %139 }
 0x102   :  { %v1954_v42 = vpop.permute.xlu0 %127  ;;  %v161_v46 = vmul.f32 %v159_v41, %v1950_v40 }
 0x103   :  { %v154_v49 = vmul.f32 %v153_v43, %v1954_v42 }
 0x105   :  { %v1963_v47 = vpop.permute.xlu1 %144 }
 0x106   :  { %v1965_v48 = vpop.permute.xlu0 %132  ;;  %v162_v50 = vmul.f32 %v160_v44, %v1963_v47 }
 0x107   :  { %v155_v51 = vmul.f32 %v152_v45, %v1965_v48 }
 0x108   :  { %v165_v54 = vpack.c.bf16 %v162_v50, %v161_v46 }
 0x109   :  { %v163_v55 = vpack.c.bf16 %v155_v51, %v154_v49 }
 0x10a   :  { %1405 = vmatmul.mubr.bf16.vlgmr.msra.gmra.mrb[0].mxu1 %v165_v54  ;;  %v1536_v54 = vld [vmem:[#allocation8 + $0x180] sm:$0xff]  }
 0x10b   :  { %398 = vmatmul.mubr.bf16.vlgmr.msra.gmra.mrb[0].mxu0 %v163_v55  ;;  %1409 = vmatpush3.bf16.msra.mxu1 %v1513_v53  ;;  %v1537_v55 = vld [vmem:[#allocation8 + $0x200] sm:$0xff]  }
 0x10c   :  { %1318 = vmatpush3.bf16.msra.mxu0 %v1512_v52  ;;  %1410 = vmatprep.subr.bf16.mxu1 %v1767_v1 }
 0x10d   :  { %1319 = vmatprep.subr.bf16.mxu0 %v1514_v56  ;;  %1424 = vmatprep.mubr.msk.bf16.mxu1 %vm1768_vm0, %v1767_v1 }
 0x10f   :  { %1411 = vmatpush3.bf16.msra.mxu1 %v1516_v58  ;;  %v1538_v58 = vld [vmem:[#allocation8 + $0x1c8] sm:$0xff]  }
 0x110   :  { %1320 = vmatpush3.bf16.msra.mxu0 %v1515_v57  ;;  %1412 = vmatprep.subr.bf16.mxu1 %v1767_v1 }
 0x111   :  { %1321 = vmatprep.subr.bf16.mxu0 %v1517_v59  ;;  %v1539_v59 = vld [vmem:[#allocation8 + $0x188] sm:$0xff]  }
 0x113   :  { %1413 = vmatpush3.bf16.msra.mxu1 %v1519_v61  ;;  %v1541_v61 = vld [vmem:[#allocation8 + $0x1d0] sm:$0xff]  }
 0x114   :  { %1322 = vmatpush3.bf16.msra.mxu0 %v1518_v60  ;;  %1414 = vmatprep.subr.bf16.mxu1 %v1767_v1  ;;  %v1540_v60 = vld [vmem:[#allocation8 + $0x208] sm:$0xff]  }
 0x115   :  { %1323 = vmatprep.subr.bf16.mxu0 %v1520_v62  ;;  %v1542_v62 = vld [vmem:[#allocation8 + $0x190] sm:$0xff]  }
 0x117   :  { %1415 = vmatpush3.bf16.msra.mxu1 %v1522_v0  ;;  %v1544_v0 = vld [vmem:[#allocation8 + $0x1d8] sm:$0xff]  }
 0x118   :  { %1324 = vmatpush3.bf16.msra.mxu0 %v1521_v63  ;;  %1416 = vmatprep.subr.bf16.mxu1 %v1767_v1  ;;  %v1543_v63 = vld [vmem:[#allocation8 + $0x210] sm:$0xff]  }
 0x119   :  { %1325 = vmatprep.subr.bf16.mxu0 %v1523_v2  ;;  %v1545_v2 = vld [vmem:[#allocation8 + $0x198] sm:$0xff]  }
 0x11b   :  { %1417 = vmatpush3.bf16.msra.mxu1 %v1525_v4  ;;  %v1547_v4 = vld [vmem:[#allocation8 + $0x1e0] sm:$0xff]  }
 0x11c   :  { %1326 = vmatpush3.bf16.msra.mxu0 %v1524_v3  ;;  %1418 = vmatprep.subr.bf16.mxu1 %v1767_v1  ;;  %v1546_v3 = vld [vmem:[#allocation8 + $0x218] sm:$0xff]  }
 0x11d   :  { %1327 = vmatprep.subr.bf16.mxu0 %v1526_v5  ;;  %v1548_v5 = vld [vmem:[#allocation8 + $0x1a0] sm:$0xff]  }
 0x11f   :  { %1419 = vmatpush3.bf16.msra.mxu1 %v1528_v7  ;;  %v1550_v7 = vld [vmem:[#allocation8 + $0x1e8] sm:$0xff]  }
 0x120   :  { %1328 = vmatpush3.bf16.msra.mxu0 %v1527_v6  ;;  %1420 = vmatprep.subr.bf16.mxu1 %v1767_v1  ;;  %v1549_v6 = vld [vmem:[#allocation8 + $0x220] sm:$0xff]  }
 0x121   :  { %1329 = vmatprep.subr.bf16.mxu0 %v1529_v8  ;;  %v1551_v8 = vld [vmem:[#allocation8 + $0x1a8] sm:$0xff]  }
 0x123   :  { %1421 = vmatpush3.bf16.msra.mxu1 %v1531_v10  ;;  %v1553_v10 = vld [vmem:[#allocation8 + $0x1f0] sm:$0xff]  }
 0x124   :  { %1330 = vmatpush3.bf16.msra.mxu0 %v1530_v9  ;;  %1422 = vmatprep.subr.bf16.mxu1 %v1767_v1  ;;  %v1552_v9 = vld [vmem:[#allocation8 + $0x228] sm:$0xff]  }
 0x125   :  { %1331 = vmatprep.subr.bf16.mxu0 %v1532_v11  ;;  %v1554_v11 = vld [vmem:[#allocation8 + $0x1b0] sm:$0xff]  }
 0x127   :  { %1423 = vmatpush3.bf16.msra.mxu1 %v1534_v13  ;;  %v1556_v13 = vld [vmem:[#allocation8 + $0x1f8] sm:$0xff]  }
 0x128   :  { %1332 = vmatpush3.bf16.msra.mxu0 %v1533_v12  ;;  %1428 = vmatprep.subr.bf16.mxu1 %v1767_v1  ;;  %v1555_v12 = vld [vmem:[#allocation8 + $0x230] sm:$0xff]  }
 0x129   :  { %1348 = vmatprep.subr.bf16.mxu0 %v1535_v14  ;;  %v1557_v14 = vld [vmem:[#allocation8 + $0x1b8] sm:$0xff]  }
 0x1dd   :  { %v440_v16 = vpop.f32.mrb[0].mxu1 }
 0x1de   :  { %v1302_v15 = vpop.f32.mrb[0].mxu0  ;;  %v1406_v19 = vpop.f32.mrb[1].mxu1 }
 0x1df   :  { %v1303_v18 = vpop.f32.mrb[1].mxu0  ;;  %v443_v24 = vpop.f32.mrb[2].mxu1 }
 0x1e0   :  { %v1304_v20 = vadd.f32 %v1303_v18, %v1302_v15  ;;  %v1305_v21 = vpop.f32.mrb[2].mxu0  ;;  %v1407_v26 = vpop.f32.mrb[3].mxu1  ;;  %v1558_v15 = vld [vmem:[#allocation8 + $0x238] sm:$0xff]   ;;  %v1227_v18 = vld [vmem:[#allocation10 + $0x1] ss:$0 sm:$0xff] }
 0x1e1   :  { %v1306_v25 = vpop.f32.mrb[3].mxu0 }
 0x1e2   :  { %v400_v27 = vadd.f32 %v1304_v20, %v1202_v17  ;;  %v1307_v28 = vadd.f32 %v1306_v25, %v1305_v21 }
 0x1e4   :  { %v441_v29 = vadd.f32 %v440_v16, %v400_v27  ;;  %v403_v30 = vadd.f32 %v1307_v28, %v1202_v17 }
 0x1e6   :  { %vm447_vm3 = vcmp.gt.f32.partialorder %v441_v29, 0.0  ;;  %v449_v31 = vmul.f32 0.01, %v441_v29  ;;  %v444_v32 = vadd.f32 %v443_v24, %v403_v30 }
 0x1e8   :  { %v451_v33 = vsel %vm447_vm3, %v441_v29, %v449_v31  ;;  %vm448_vm4 = vcmp.gt.f32.partialorder %v444_v32, 0.0  ;;  %v450_v34 = vmul.f32 0.01, %v444_v32 }
 0x1e9   :  { %v1981_v36 = vadd.f32 %v451_v33, %v1932_v22 }
 0x1ea   :  { %v452_v37 = vsel %vm448_vm4, %v444_v32, %v450_v34 }
 0x1eb   :  { %v1984_v38 = vadd.f32 %v452_v37, %v1934_v23  ;;  %v455_v39 = vrot.slane %v1981_v36, 7  ;;  %v461_v44 = vrot.slane %v1981_v36, 1 }
 0x1ed   :  { %v468_v41 = vpack.c.bf16 %v1984_v38, %v1981_v36  ;;  %v456_v43 = vrot.slane %v1984_v38, 7  ;;  %v462_v45 = vrot.slane %v1984_v38, 1 }
 0x1ef   :  { %703 = vmatprep.mubr.bf16.mxu0 %v468_v41  ;;  %v457_v22 = vsel %vm151_vm2, %v455_v39, %v456_v43  ;;  %v458_v46 = vsel %vm151_vm2, %v456_v43, %v455_v39  ;;  %v463_v23 = vsel %vm158_vm1, %v461_v44, %v462_v45  ;;  %v464_v49 = vsel %vm158_vm1, %v462_v45, %v461_v44 }
 0x1f0   :  { %v459_v50 = vmul.f32 %v458_v46, %v1954_v42  ;;  %v460_v51 = vmul.f32 %v457_v22, %v1965_v48  ;;  %v465_v52 = vmul.f32 %v463_v23, %v1950_v40  ;;  %v466_v53 = vmul.f32 %v464_v49, %v1963_v47 }
 0x1f2   :  { %v467_v56 = vpack.c.bf16 %v460_v51, %v459_v50  ;;  %v469_v57 = vpack.c.bf16 %v466_v53, %v465_v52 }
 0x1f4   :  { %704 = vmatmul.mubr.bf16.vlgmr.msra.gmra.mrb[4].mxu0 %v467_v56  ;;  %1425 = vmatmul.mubr.bf16.vlgmr.msra.gmra.mrb[4].mxu1 %v469_v57 }
 0x1f5   :  { %1349 = vmatpush3.bf16.msra.mxu0 %v1536_v54  ;;  %1429 = vmatpush3.bf16.msra.mxu1 %v1537_v55  ;;  %v1559_v55 = vld [vmem:[#allocation11] sm:$0xff]  }
 0x1f6   :  { %1350 = vmatprep.subr.bf16.mxu0 %v1538_v58  ;;  %1430 = vmatprep.subr.bf16.mxu1 %v1767_v1  ;;  %v1560_v58 = vld [vmem:[#allocation11 + $0x8] sm:$0xff]  }
 0x1f7   :  { %1444 = vmatprep.mubr.msk.bf16.mxu1 %vm1768_vm0, %v1767_v1 }
 0x1f9   :  { %1351 = vmatpush3.bf16.msra.mxu0 %v1539_v59  ;;  %1431 = vmatpush3.bf16.msra.mxu1 %v1540_v60  ;;  %v1566_v59 = vld [vmem:[#allocation11 + $0x38] sm:$0xff]  }
 0x1fa   :  { %1352 = vmatprep.subr.bf16.mxu0 %v1541_v61  ;;  %1432 = vmatprep.subr.bf16.mxu1 %v1767_v1 }
 0x1fd   :  { %1353 = vmatpush3.bf16.msra.mxu0 %v1542_v62  ;;  %1433 = vmatpush3.bf16.msra.mxu1 %v1543_v63  ;;  %v1252_v62 = vld [vmem:[#allocation10 + $0x2] ss:$0 sm:$0xff] }
 0x1fe   :  { %1434 = vmatprep.subr.bf16.mxu1 %v1767_v1  ;;  %1354 = vmatprep.subr.bf16.mxu0 %v1544_v0 }
 0x201   :  { %1355 = vmatpush3.bf16.msra.mxu0 %v1545_v2  ;;  %1435 = vmatpush3.bf16.msra.mxu1 %v1546_v3 }
 0x202   :  { %1436 = vmatprep.subr.bf16.mxu1 %v1767_v1  ;;  %1356 = vmatprep.subr.bf16.mxu0 %v1547_v4 }
 0x205   :  { %1357 = vmatpush3.bf16.msra.mxu0 %v1548_v5  ;;  %1437 = vmatpush3.bf16.msra.mxu1 %v1549_v6 }
 0x206   :  { %1438 = vmatprep.subr.bf16.mxu1 %v1767_v1  ;;  %1358 = vmatprep.subr.bf16.mxu0 %v1550_v7 }
 0x209   :  { %1359 = vmatpush3.bf16.msra.mxu0 %v1551_v8  ;;  %1439 = vmatpush3.bf16.msra.mxu1 %v1552_v9 }
 0x20a   :  { %1440 = vmatprep.subr.bf16.mxu1 %v1767_v1  ;;  %1360 = vmatprep.subr.bf16.mxu0 %v1553_v10 }
 0x20d   :  { %1361 = vmatpush3.bf16.msra.mxu0 %v1554_v11  ;;  %1441 = vmatpush3.bf16.msra.mxu1 %v1555_v12 }
 0x20e   :  { %1442 = vmatprep.subr.bf16.mxu1 %v1767_v1  ;;  %1362 = vmatprep.subr.bf16.mxu0 %v1556_v13 }
 0x211   :  { %1363 = vmatpush3.bf16.msra.mxu0 %v1557_v14  ;;  %1443 = vmatpush3.bf16.msra.mxu1 %v1558_v15 }
 0x212   :  { %1448 = vmatprep.subr.bf16.mxu0 %v1767_v1 }
 0x2c7   :  { %v1333_v16 = vpop.f32.mrb[4].mxu0  ;;  %v746_v17 = vpop.f32.mrb[4].mxu1 }
 0x2c8   :  { %v1334_v19 = vpop.f32.mrb[5].mxu0  ;;  %v1426_v20 = vpop.f32.mrb[5].mxu1 }
 0x2c9   :  { %v1335_v21 = vadd.f32 %v1334_v19, %v1333_v16  ;;  %v1336_v24 = vpop.f32.mrb[6].mxu0  ;;  %v749_v25 = vpop.f32.mrb[6].mxu1 }
 0x2ca   :  { %v1337_v26 = vpop.f32.mrb[7].mxu0  ;;  %v1427_v27 = vpop.f32.mrb[7].mxu1 }
 0x2cb   :  { %v706_v28 = vadd.f32 %v1335_v21, %v1227_v18  ;;  %v1338_v29 = vadd.f32 %v1337_v26, %v1336_v24 }
 0x2cd   :  { %v747_v30 = vadd.f32 %v746_v17, %v706_v28  ;;  %v709_v31 = vadd.f32 %v1338_v29, %v1227_v18  ;;  %v1277_v18 = vld [vmem:[#allocation13] ss:$0 sm:$0xff] }
 0x2cf   :  { %vm753_vm5 = vcmp.gt.f32.partialorder %v747_v30, 0.0  ;;  %v755_v32 = vmul.f32 0.01, %v747_v30  ;;  %v750_v33 = vadd.f32 %v749_v25, %v709_v31 }
 0x2d1   :  { %v757_v34 = vsel %vm753_vm5, %v747_v30, %v755_v32  ;;  %vm754_vm6 = vcmp.gt.f32.partialorder %v750_v33, 0.0  ;;  %v756_v37 = vmul.f32 0.01, %v750_v33 }
 0x2d2   :  { %v2015_v39 = vadd.f32 %v757_v34, %v1981_v36 }
 0x2d3   :  { %v758_v41 = vsel %vm754_vm6, %v750_v33, %v756_v37 }
 0x2d4   :  { %v2018_v43 = vadd.f32 %v758_v41, %v1984_v38  ;;  %v761_v44 = vrot.slane %v2015_v39, 7  ;;  %v767_v46 = vrot.slane %v2015_v39, 1 }
 0x2d6   :  { %v774_v45 = vpack.c.bf16 %v2018_v43, %v2015_v39  ;;  %v762_v22 = vrot.slane %v2018_v43, 7  ;;  %v768_v23 = vrot.slane %v2018_v43, 1 }
 0x2d8   :  { %1009 = vmatprep.mubr.bf16.mxu0 %v774_v45  ;;  %v763_v36 = vsel %vm151_vm2, %v761_v44, %v762_v22  ;;  %v764_v49 = vsel %vm151_vm2, %v762_v22, %v761_v44  ;;  %v769_v38 = vsel %vm158_vm1, %v767_v46, %v768_v23  ;;  %v770_v50 = vsel %vm158_vm1, %v768_v23, %v767_v46 }
 0x2d9   :  { %v765_v51 = vmul.f32 %v764_v49, %v1954_v42  ;;  %v766_v52 = vmul.f32 %v763_v36, %v1965_v48  ;;  %v771_v53 = vmul.f32 %v769_v38, %v1950_v40  ;;  %v772_v54 = vmul.f32 %v770_v50, %v1963_v47  ;;  %v1562_v40 = vld [vmem:[#allocation11 + $0x18] sm:$0xff]   ;;  %v1563_v42 = vld [vmem:[#allocation11 + $0x20] sm:$0xff]   ;;  %v1564_v47 = vld [vmem:[#allocation11 + $0x28] sm:$0xff]  }
 0x2da   :  { %v1565_v48 = vld [vmem:[#allocation11 + $0x30] sm:$0xff]  }
 0x2db   :  { %v773_v56 = vpack.c.bf16 %v766_v52, %v765_v51  ;;  %v775_v57 = vpack.c.bf16 %v772_v54, %v771_v53 }
 0x2dd   :  { %1010 = vmatmul.mubr.bf16.vlgmr.msra.gmra.mrb[8].mxu0 %v773_v56  ;;  %1445 = vmatmul.mubr.bf16.vlgmr.msra.gmra.mrb[8].mxu1 %v775_v57 }
 0x2de   :  { %1449 = vmatpush3.bf16.msra.mxu0 %v1559_v55  ;;  %1464 = vmatprep.mubr.msk.bf16.mxu0 %vm1768_vm0, %v1767_v1 }
 0x2df   :  { %1450 = vmatprep.subr.bf16.mxu0 %v1767_v1 }
 0x2e2   :  { %1451 = vmatpush3.bf16.msra.mxu0 %v1560_v58 }
 0x2e3   :  { %1452 = vmatprep.subr.bf16.mxu0 %v1767_v1 }
 0x2e6   :  { %1453 = vmatpush3.bf16.msra.mxu0 %v1561_v35 }
 0x2e7   :  { %1454 = vmatprep.subr.bf16.mxu0 %v1767_v1 }
 0x2ea   :  { %1455 = vmatpush3.bf16.msra.mxu0 %v1562_v40 }
 0x2eb   :  { %1456 = vmatprep.subr.bf16.mxu0 %v1767_v1 }
 0x2ee   :  { %1457 = vmatpush3.bf16.msra.mxu0 %v1563_v42 }
 0x2ef   :  { %1458 = vmatprep.subr.bf16.mxu0 %v1767_v1 }
 0x2f2   :  { %1459 = vmatpush3.bf16.msra.mxu0 %v1564_v47 }
 0x2f3   :  { %1460 = vmatprep.subr.bf16.mxu0 %v1767_v1 }
 0x2f6   :  { %1461 = vmatpush3.bf16.msra.mxu0 %v1565_v48 }
 0x2f7   :  { %1462 = vmatprep.subr.bf16.mxu0 %v1767_v1 }
 0x2fa   :  { %1463 = vmatpush3.bf16.msra.mxu0 %v1566_v59 }
 0x3b0   :  { %v1364_v60 = vpop.f32.mrb[8].mxu0  ;;  %v1052_v61 = vpop.f32.mrb[8].mxu1 }
 0x3b1   :  { %v1365_v63 = vpop.f32.mrb[9].mxu0  ;;  %v1446_v0 = vpop.f32.mrb[9].mxu1 }
 0x3b2   :  { %v1366_v2 = vadd.f32 %v1365_v63, %v1364_v60  ;;  %v1367_v3 = vpop.f32.mrb[10].mxu0  ;;  %v1055_v4 = vpop.f32.mrb[10].mxu1 }
 0x3b3   :  { %v1368_v5 = vpop.f32.mrb[11].mxu0  ;;  %v1447_v6 = vpop.f32.mrb[11].mxu1 }
 0x3b4   :  { %v1012_v7 = vadd.f32 %v1366_v2, %v1252_v62  ;;  %v1369_v8 = vadd.f32 %v1368_v5, %v1367_v3 }
 0x3b6   :  { %v1053_v9 = vadd.f32 %v1052_v61, %v1012_v7  ;;  %v1015_v10 = vadd.f32 %v1369_v8, %v1252_v62 }
 0x3b8   :  { %vm1059_vm7 = vcmp.gt.f32.partialorder %v1053_v9, 0.0  ;;  %v1061_v11 = vmul.f32 0.01, %v1053_v9  ;;  %v1056_v12 = vadd.f32 %v1055_v4, %v1015_v10 }
 0x3ba   :  { %v1063_v1 = vsel %vm1059_vm7, %v1053_v9, %v1061_v11  ;;  %vm1060_vm8 = vcmp.gt.f32.partialorder %v1056_v12, 0.0  ;;  %v1062_v13 = vmul.f32 0.01, %v1056_v12 }
 0x3bb   :  { %v1065_v15 = vadd.f32 %v1063_v1, %v2015_v39 }
 0x3bc   :  { %v1064_v14 = vsel %vm1060_vm8, %v1056_v12, %v1062_v13 }
 0x3bd   :  { %v1066_v16 = vadd.f32 %v1064_v14, %v2018_v43 }
 0x3bf   :  { %v1067_v17 = vpack.c.bf16 %v1066_v16, %v1065_v15 }
 0x3c1   :  { %1465 = vmatmul.mubr.bf16.vlgmr.msra.gmra.mrb[12].mxu0 %v1067_v17 }
 0x494   :  { %v1173_v19 = vpop.f32.mrb[12].mxu0 }
 0x495   :  { %v1174_v20 = vadd.f32 %v1277_v18, %v1173_v19  ;;  %v1466_v21 = vpop.f32.mrb[13].mxu0 }
 0x496   :  { %v1176_v24 = vpop.f32.mrb[14].mxu0 }
 0x497   :  { %1180 = vst [vmem:[#allocation14] sm:$0xff] %v1174_v20  ;;  %v1177_v25 = vadd.f32 %v1277_v18, %v1176_v24  ;;  %v1467_v26 = vpop.f32.mrb[15].mxu0 }
 0x499   :  { %1181 = vst [vmem:[#allocation14 + $0x8] sm:$0xff] %v1177_v25 }
 0x49a   :  { %1732 = shalt.err (!%p1729_p4)
}
 0x49b   :  { %s1733_s22 = scalar_lea.hbm %s2071_s7, 256 }
 0x49c   :  { %p1734_p5 = scmp.ne.s32.totalorder %s2071_s7, %s1733_s22  ;;  %p1737_p6 = scmp.lt.u32.totalorder %s1733_s22, %s2071_s7 }
 0x49e   :  { %p1739_p7 = pnand %p1737_p6, %p1734_p5 }
 0x4a0   :  { %1742 = shalt.err (!%p1739_p7)
}
 0x4a1   :  { %1193 = dma.vmem_to_hbm [thread:$0]  %s1188_s27, 256, %s2071_s7, [#allocation4], %s1755_s13, %s1755_s13, %s1756_s14  }
 0x4a2   :  { %1751 = dma.done.wait [#allocation4], 256  }
 0x4a3   :  { %1752 = vsyncadd [#allocation4], 4294967040 }
 0x4a4   :  { %1197 = vsyncpa [#allocation3], 1 }
 0x4a5   :  { %1198 = vsyncpa [#allocation6], 1 }
 0x4a6   :  { %1199 = vsyncpa [#allocation9], 1 }
 0x4a7   :  { %1200 = vsyncpa [#allocation12], 1 }
 0x4a8   :  { %1201 = vsyncpa [#allocation4], 1 }

</bundles_post_ra>
